<compile_context>
chip_gen: v7x
topology: tpu7x:2x2x1
jax: 0.10.0
libtpu: 0.0.40
codegen_flags: <defaults>
</compile_context>

<pallas_src>
import jax
import jax.numpy as jnp
from jax import lax
from jax.experimental import pallas as pl
from jax.experimental.pallas import tpu as pltpu


def rnn_fc_kernel(x_ref, w_ih_ref, w_hh_ref, b_ref, w_fc_ref, b_fc_ref,
                  out_ref, xproj_ref):
    # x_ref is time-major & flattened: (T*B, I).  xproj_ref scratch is (T, B, H).
    T, B, H = xproj_ref.shape

    # (1) Hoisted input projection: one MXU matmul for all T timesteps at once
    #     (much better MXU row occupancy than T tiny per-step matmuls), plus
    #     the fused RNN bias (b_ih + b_hh).  Parked in VMEM scratch laid out
    #     (T, B, H) so the per-step slice is a cheap leading-axis index.
    xproj_ref[...] = (
        jnp.dot(x_ref[...], w_ih_ref[...], preferred_element_type=jnp.float32)
        + b_ref[...]
    ).reshape(T, B, H)

    w_hh = w_hh_ref[...]

    # (2) t == 0: h_0 = 0, so h_1 = tanh(x_proj[0]) — skip the h @ W_hh matmul.
    h0 = jnp.tanh(xproj_ref[0])

    # (3) Serial recurrence, fully unrolled so the LLO scheduler sees the whole
    #     chain; exactly one small MXU matmul + tanh per step.
    def step(t, h):
        return jnp.tanh(
            jnp.dot(h, w_hh, preferred_element_type=jnp.float32) + xproj_ref[t])

    h_last = lax.fori_loop(1, T, step, h0, unroll=True)

    # (4) Final fully-connected layer on the last hidden state.
    out_ref[...] = (
        jnp.dot(h_last, w_fc_ref[...], preferred_element_type=jnp.float32)
        + b_fc_ref[...]).astype(out_ref.dtype)


def rnn_model_forward(x, w_ih, w_hh, b_ih, b_hh, w_fc, b_fc):
    """x: (B, T, I); w_ih: (H, I); w_hh: (H, H); b_ih/b_hh: (H,);
       w_fc: (O, H); b_fc: (O,).  Returns (B, O)."""
    B, T, I = x.shape
    H = w_hh.shape[0]
    O = w_fc.shape[0]
    # TODO(synk): num_layers > 1 not implemented (module default is 1 layer).

    # Glue (cheap XLA ops): pre-transpose weights so the kernel does row-major
    # h @ W matmuls, fuse the two RNN biases, make biases 2-D, and flatten x to
    # time-major (T*B, I) so the input projection is a single matmul.
    x_2d = jnp.transpose(x, (1, 0, 2)).reshape(T * B, I).astype(jnp.float32)
    w_ih_t = jnp.asarray(w_ih.T, jnp.float32)             # (I, H)
    w_hh_t = jnp.asarray(w_hh.T, jnp.float32)             # (H, H)
    b_rnn = (b_ih + b_hh).astype(jnp.float32)[None, :]    # (1, H)
    w_fc_t = jnp.asarray(w_fc.T, jnp.float32)             # (H, O)
    b_fc2 = jnp.asarray(b_fc, jnp.float32)[None, :]       # (1, O)

    vmem = pl.BlockSpec(memory_space=pltpu.MemorySpace.VMEM)

    return pl.pallas_call(
        rnn_fc_kernel,
        out_shape=jax.ShapeDtypeStruct((B, O), jnp.float32),
        in_specs=[vmem] * 6,          # whole (tiny) arrays resident in VMEM
        out_specs=vmem,
        scratch_shapes=[pltpu.VMEM((T, B, H), jnp.float32)],
    )(x_2d, w_ih_t, w_hh_t, b_rnn, w_fc_t, b_fc2)


def rnn_model_reference(x, w_ih, w_hh, b_ih, b_hh, w_fc, b_fc):
    """Pure-JAX reference mirroring PyTorch nn.RNN(batch_first) + Linear."""
    B, T, I = x.shape
    H = w_hh.shape[0]
    h = jnp.zeros((B, H), jnp.float32)
    for t in range(T):
        h = jnp.tanh(x[:, t, :] @ w_ih.T + b_ih + h @ w_hh.T + b_hh)
    return h @ w_fc.T + b_fc


if __name__ == "__main__":
    # Small shapes consistent with the module's forward.
    B, T = 2, 8
    input_size, hidden_size, output_size = 16, 32, 8

    key = jax.random.PRNGKey(0)
    ks = jax.random.split(key, 7)
    bound = 1.0 / jnp.sqrt(hidden_size)

    x = jax.random.normal(ks[0], (B, T, input_size), jnp.float32)
    w_ih = jax.random.uniform(ks[1], (hidden_size, input_size), jnp.float32, -bound, bound)
    w_hh = jax.random.uniform(ks[2], (hidden_size, hidden_size), jnp.float32, -bound, bound)
    b_ih = jax.random.uniform(ks[3], (hidden_size,), jnp.float32, -bound, bound)
    b_hh = jax.random.uniform(ks[4], (hidden_size,), jnp.float32, -bound, bound)
    w_fc = jax.random.uniform(ks[5], (output_size, hidden_size), jnp.float32, -bound, bound)
    b_fc = jax.random.uniform(ks[6], (output_size,), jnp.float32, -bound, bound)

    out = rnn_model_forward(x, w_ih, w_hh, b_ih, b_hh, w_fc, b_fc)
    out = jax.block_until_ready(out)

    ref = rnn_model_reference(x, w_ih, w_hh, b_ih, b_hh, w_fc, b_fc)
    assert out.shape == (B, output_size)
    assert jnp.allclose(out, ref, atol=1e-5, rtol=1e-5), (out, ref)

    print("KERNEL_OK")
</pallas_src>

<mosaic_0001>
module attributes {stable_mosaic.version = 11 : i64} {
  func.func @rnn_fc_kernel(%arg0: memref<16x16xf32, #tpu.memory_space<vmem>>, %arg1: memref<16x32xf32, #tpu.memory_space<vmem>>, %arg2: memref<32x32xf32, #tpu.memory_space<vmem>>, %arg3: memref<1x32xf32, #tpu.memory_space<vmem>>, %arg4: memref<32x8xf32, #tpu.memory_space<vmem>>, %arg5: memref<1x8xf32, #tpu.memory_space<vmem>>, %arg6: memref<2x8xf32, #tpu.memory_space<vmem>>, %arg7: memref<8x2x32xf32, #tpu.memory_space<vmem>>) attributes {dimension_semantics = [], scalar_prefetch = 0 : i64, scratch_operands = 1 : i64, tpu.core_type = #tpu.core_type<tc>} {
    %c0 = arith.constant 0 : index
    %c0_0 = arith.constant 0 : index
    %0 = vector.load %arg0[%c0, %c0_0] : memref<16x16xf32, #tpu.memory_space<vmem>>, vector<16x16xf32>
    %c0_1 = arith.constant 0 : index
    %c0_2 = arith.constant 0 : index
    %1 = vector.load %arg1[%c0_1, %c0_2] : memref<16x32xf32, #tpu.memory_space<vmem>>, vector<16x32xf32>
    %cst = arith.constant dense<0.000000e+00> : vector<16x32xf32>
    %2 = tpu.matmul %0, %1, %cst {dimension_numbers = #tpu.dot_dimension_numbers<[1], [0], [0], [1], [0, 0, 1, 1], [], []>} : vector<16x16xf32>, vector<16x32xf32>, vector<16x32xf32> -> vector<16x32xf32>
    %c0_3 = arith.constant 0 : index
    %c0_4 = arith.constant 0 : index
    %3 = vector.load %arg3[%c0_3, %c0_4] : memref<1x32xf32, #tpu.memory_space<vmem>>, vector<1x32xf32>
    %4 = vector.broadcast %3 : vector<1x32xf32> to vector<16x32xf32>
    %5 = arith.addf %2, %4 : vector<16x32xf32>
    %6 = vector.shape_cast %5 : vector<16x32xf32> to vector<8x2x32xf32>
    %c0_5 = arith.constant 0 : index
    %c0_6 = arith.constant 0 : index
    %c0_7 = arith.constant 0 : index
    %7 = vector.load %arg7[%c0_5, %c0_6, %c0_7] : memref<8x2x32xf32, #tpu.memory_space<vmem>>, vector<8x2x32xf32>
    tpu.vector_store %arg7[%c0_5, %c0_6, %c0_7], %6 {strides = array<i32>} : memref<8x2x32xf32, #tpu.memory_space<vmem>>, vector<8x2x32xf32>,
    %c0_8 = arith.constant 0 : index
    %c0_9 = arith.constant 0 : index
    %8 = vector.load %arg2[%c0_8, %c0_9] : memref<32x32xf32, #tpu.memory_space<vmem>>, vector<32x32xf32>
    %c0_10 = arith.constant 0 : index
    %c0_11 = arith.constant 0 : index
    %c0_12 = arith.constant 0 : index
    %9 = vector.load %arg7[%c0_10, %c0_11, %c0_12] : memref<8x2x32xf32, #tpu.memory_space<vmem>>, vector<1x2x32xf32>
    %10 = vector.shape_cast %9 : vector<1x2x32xf32> to vector<2x32xf32>
    %11 = math.tanh %10 : vector<2x32xf32>
    %c1_i32 = arith.constant 1 : i32
    %cst_13 = arith.constant dense<0.000000e+00> : vector<2x32xf32>
    %12 = tpu.matmul %11, %8, %cst_13 {dimension_numbers = #tpu.dot_dimension_numbers<[1], [0], [0], [1], [0, 0, 1, 1], [], []>} : vector<2x32xf32>, vector<32x32xf32>, vector<2x32xf32> -> vector<2x32xf32>
    %13 = arith.index_cast %c1_i32 : i32 to index
    %c0_14 = arith.constant 0 : index
    %c0_15 = arith.constant 0 : index
    %14 = vector.load %arg7[%13, %c0_14, %c0_15] : memref<8x2x32xf32, #tpu.memory_space<vmem>>, vector<1x2x32xf32>
    %15 = vector.shape_cast %14 : vector<1x2x32xf32> to vector<2x32xf32>
    %16 = arith.addf %12, %15 : vector<2x32xf32>
    %17 = math.tanh %16 : vector<2x32xf32>
    %c2_i32 = arith.constant 2 : i32
    %cst_16 = arith.constant dense<0.000000e+00> : vector<2x32xf32>
    %18 = tpu.matmul %17, %8, %cst_16 {dimension_numbers = #tpu.dot_dimension_numbers<[1], [0], [0], [1], [0, 0, 1, 1], [], []>} : vector<2x32xf32>, vector<32x32xf32>, vector<2x32xf32> -> vector<2x32xf32>
    %19 = arith.index_cast %c2_i32 : i32 to index
    %c0_17 = arith.constant 0 : index
    %c0_18 = arith.constant 0 : index
    %20 = vector.load %arg7[%19, %c0_17, %c0_18] : memref<8x2x32xf32, #tpu.memory_space<vmem>>, vector<1x2x32xf32>
    %21 = vector.shape_cast %20 : vector<1x2x32xf32> to vector<2x32xf32>
    %22 = arith.addf %18, %21 : vector<2x32xf32>
    %23 = math.tanh %22 : vector<2x32xf32>
    %c3_i32 = arith.constant 3 : i32
    %cst_19 = arith.constant dense<0.000000e+00> : vector<2x32xf32>
    %24 = tpu.matmul %23, %8, %cst_19 {dimension_numbers = #tpu.dot_dimension_numbers<[1], [0], [0], [1], [0, 0, 1, 1], [], []>} : vector<2x32xf32>, vector<32x32xf32>, vector<2x32xf32> -> vector<2x32xf32>
    %25 = arith.index_cast %c3_i32 : i32 to index
    %c0_20 = arith.constant 0 : index
    %c0_21 = arith.constant 0 : index
    %26 = vector.load %arg7[%25, %c0_20, %c0_21] : memref<8x2x32xf32, #tpu.memory_space<vmem>>, vector<1x2x32xf32>
    %27 = vector.shape_cast %26 : vector<1x2x32xf32> to vector<2x32xf32>
    %28 = arith.addf %24, %27 : vector<2x32xf32>
    %29 = math.tanh %28 : vector<2x32xf32>
    %c4_i32 = arith.constant 4 : i32
    %cst_22 = arith.constant dense<0.000000e+00> : vector<2x32xf32>
    %30 = tpu.matmul %29, %8, %cst_22 {dimension_numbers = #tpu.dot_dimension_numbers<[1], [0], [0], [1], [0, 0, 1, 1], [], []>} : vector<2x32xf32>, vector<32x32xf32>, vector<2x32xf32> -> vector<2x32xf32>
    %31 = arith.index_cast %c4_i32 : i32 to index
    %c0_23 = arith.constant 0 : index
    %c0_24 = arith.constant 0 : index
    %32 = vector.load %arg7[%31, %c0_23, %c0_24] : memref<8x2x32xf32, #tpu.memory_space<vmem>>, vector<1x2x32xf32>
    %33 = vector.shape_cast %32 : vector<1x2x32xf32> to vector<2x32xf32>
    %34 = arith.addf %30, %33 : vector<2x32xf32>
    %35 = math.tanh %34 : vector<2x32xf32>
    %c5_i32 = arith.constant 5 : i32
    %cst_25 = arith.constant dense<0.000000e+00> : vector<2x32xf32>
    %36 = tpu.matmul %35, %8, %cst_25 {dimension_numbers = #tpu.dot_dimension_numbers<[1], [0], [0], [1], [0, 0, 1, 1], [], []>} : vector<2x32xf32>, vector<32x32xf32>, vector<2x32xf32> -> vector<2x32xf32>
    %37 = arith.index_cast %c5_i32 : i32 to index
    %c0_26 = arith.constant 0 : index
    %c0_27 = arith.constant 0 : index
    %38 = vector.load %arg7[%37, %c0_26, %c0_27] : memref<8x2x32xf32, #tpu.memory_space<vmem>>, vector<1x2x32xf32>
    %39 = vector.shape_cast %38 : vector<1x2x32xf32> to vector<2x32xf32>
    %40 = arith.addf %36, %39 : vector<2x32xf32>
    %41 = math.tanh %40 : vector<2x32xf32>
    %c6_i32 = arith.constant 6 : i32
    %cst_28 = arith.constant dense<0.000000e+00> : vector<2x32xf32>
    %42 = tpu.matmul %41, %8, %cst_28 {dimension_numbers = #tpu.dot_dimension_numbers<[1], [0], [0], [1], [0, 0, 1, 1], [], []>} : vector<2x32xf32>, vector<32x32xf32>, vector<2x32xf32> -> vector<2x32xf32>
    %43 = arith.index_cast %c6_i32 : i32 to index
    %c0_29 = arith.constant 0 : index
    %c0_30 = arith.constant 0 : index
    %44 = vector.load %arg7[%43, %c0_29, %c0_30] : memref<8x2x32xf32, #tpu.memory_space<vmem>>, vector<1x2x32xf32>
    %45 = vector.shape_cast %44 : vector<1x2x32xf32> to vector<2x32xf32>
    %46 = arith.addf %42, %45 : vector<2x32xf32>
    %47 = math.tanh %46 : vector<2x32xf32>
    %c7_i32 = arith.constant 7 : i32
    %cst_31 = arith.constant dense<0.000000e+00> : vector<2x32xf32>
    %48 = tpu.matmul %47, %8, %cst_31 {dimension_numbers = #tpu.dot_dimension_numbers<[1], [0], [0], [1], [0, 0, 1, 1], [], []>} : vector<2x32xf32>, vector<32x32xf32>, vector<2x32xf32> -> vector<2x32xf32>
    %49 = arith.index_cast %c7_i32 : i32 to index
    %c0_32 = arith.constant 0 : index
    %c0_33 = arith.constant 0 : index
    %50 = vector.load %arg7[%49, %c0_32, %c0_33] : memref<8x2x32xf32, #tpu.memory_space<vmem>>, vector<1x2x32xf32>
    %51 = vector.shape_cast %50 : vector<1x2x32xf32> to vector<2x32xf32>
    %52 = arith.addf %48, %51 : vector<2x32xf32>
    %53 = math.tanh %52 : vector<2x32xf32>
    %c7_i32_34 = arith.constant 7 : i32
    %c0_35 = arith.constant 0 : index
    %c0_36 = arith.constant 0 : index
    %54 = vector.load %arg4[%c0_35, %c0_36] : memref<32x8xf32, #tpu.memory_space<vmem>>, vector<32x8xf32>
    %cst_37 = arith.constant dense<0.000000e+00> : vector<2x8xf32>
    %55 = tpu.matmul %53, %54, %cst_37 {dimension_numbers = #tpu.dot_dimension_numbers<[1], [0], [0], [1], [0, 0, 1, 1], [], []>} : vector<2x32xf32>, vector<32x8xf32>, vector<2x8xf32> -> vector<2x8xf32>
    %c0_38 = arith.constant 0 : index
    %c0_39 = arith.constant 0 : index
    %56 = vector.load %arg5[%c0_38, %c0_39] : memref<1x8xf32, #tpu.memory_space<vmem>>, vector<1x8xf32>
    %57 = vector.broadcast %56 : vector<1x8xf32> to vector<2x8xf32>
    %58 = arith.addf %55, %57 : vector<2x8xf32>
    %c0_40 = arith.constant 0 : index
    %c0_41 = arith.constant 0 : index
    %59 = vector.load %arg6[%c0_40, %c0_41] : memref<2x8xf32, #tpu.memory_space<vmem>>, vector<2x8xf32>
    tpu.vector_store %arg6[%c0_40, %c0_41], %58 {strides = array<i32>} : memref<2x8xf32, #tpu.memory_space<vmem>>, vector<2x8xf32>,
    return
  }
}

</mosaic_0001>

<bundles_post_ra>
// kernel: tpu_custom_call.1
= control target key start
LH: loop header
LB: loop body
LE: loop exit
PB: predicated region body
PF: predicated region fallthrough
CT: control target
= control target key end

     0   :  { %11 = vsyncpa [#allocation4], 0  ;;  %s1315_s0 = inlined_call_operand.hbm [shape: f32[16,16], index: 0, kind: input, shape index: {}]   ;;  %s1316_s1 = inlined_call_operand.hbm [shape: f32[16,32], index: 1, kind: input, shape index: {}]   ;;  %s1317_s2 = inlined_call_operand.vmem [shape: f32[32,32], index: 2, kind: input, shape index: {}]   ;;  %s1318_s3 = inlined_call_operand.vmem [shape: f32[1,32], index: 3, kind: input, shape index: {}]   ;;  %s1319_s4 = inlined_call_operand.vmem [shape: f32[32,8], index: 4, kind: input, shape index: {}]   ;;  %s1320_s5 = inlined_call_operand.vmem [shape: f32[1,8], index: 5, kind: input, shape index: {}]   ;;  %s1321_s6 = inlined_call_operand.hbm [shape: f32[2,8], index: 6, kind: output, shape index: {}]  }
   0x1   :  { %12 = vsyncpa [#allocation7], 0 }
   0x2   :  { %13 = vsyncpa [#allocation5], 0  ;;  %s1139_s21 = smov [#allocation3]   ;;  %s1067_s25 = scalar_lea.hbm %s1315_s0, 256 }
   0x3   :  { %s19_s22 = sshll.u32 %s1139_s21, 4  ;;  %p1068_p0 = scmp.ne.s32.totalorder %s1315_s0, %s1067_s25  ;;  %s20_s22 = int_to_ptr.vmem [resolvable:$true] %s19_s22 }
   0x4   :  { %p1071_p1 = scmp.lt.u32.totalorder %s1067_s25, %s1315_s0 }
   0x6   :  { %p1073_p2 = pnand %p1071_p1, %p1068_p0 }
   0x8   :  { %1076 = shalt.err (!%p1073_p2)
}
   0x9   :  { %s1077_s30 = scalar_lea.vmem %s20_s22, 256  ;;  %p1082_p4 = scmp.lt.s32.totalorder %s20_s22, %s20_s22 }
   0xa   :  { %p1078_p3 = scmp.ne.s32.totalorder %s20_s22, %s1077_s30  ;;  %p1083_p5 = scmp.lt.s32.totalorder %s1077_s30, %s1077_s30 }
   0xc   :  { %p1084_p6 = por %p1083_p5, %p1082_p4 }
   0xe   :  { %p1085_p7 = pnand %p1084_p6, %p1078_p3 }
  0x10   :  { %1088 = shalt.err (!%p1085_p7)
}
  0x11   :  { %s1140_s7 = smov 128   ;;  %s1141_s8 = smov 8  }
  0x12   :  { %25 = dma.hbm_to_vmem [thread:$0]  %s1315_s0, 256, %s20_s22, [#allocation4], %s1140_s7, %s1140_s7, %s1141_s8  }
  0x13   :  { %s1142_s11 = smov [#allocation6]   ;;  %s1089_s15 = scalar_lea.hbm %s1316_s1, 256 }
  0x14   :  { %s31_s12 = sshll.u32 %s1142_s11, 4  ;;  %p1090_p8 = scmp.ne.s32.totalorder %s1316_s1, %s1089_s15  ;;  %s32_s12 = int_to_ptr.vmem [resolvable:$true] %s31_s12 }
  0x15   :  { %p1093_p9 = scmp.lt.u32.totalorder %s1089_s15, %s1316_s1 }
  0x17   :  { %p1095_p10 = pnand %p1093_p9, %p1090_p8 }
  0x19   :  { %1098 = shalt.err (!%p1095_p10)
}
  0x1a   :  { %s1099_s20 = scalar_lea.vmem %s32_s12, 256  ;;  %p1104_p12 = scmp.lt.s32.totalorder %s32_s12, %s32_s12 }
  0x1b   :  { %p1100_p11 = scmp.ne.s32.totalorder %s32_s12, %s1099_s20  ;;  %p1105_p13 = scmp.lt.s32.totalorder %s1099_s20, %s1099_s20 }
  0x1d   :  { %p1106_p0 = por %p1105_p13, %p1104_p12 }
  0x1f   :  { %p1107_p1 = pnand %p1106_p0, %p1100_p11 }
  0x21   :  { %1110 = shalt.err (!%p1107_p1)
}
  0x22   :  { %37 = dma.hbm_to_vmem [thread:$0]  %s1316_s1, 256, %s32_s12, [#allocation7], %s1140_s7, %s1140_s7, %s1141_s8  }
  0x23   :  { %1133 = dma.done.wait [#allocation4], 256  }
  0x24   :  { %1134 = vsyncadd [#allocation4], 4294967040 }
  0x25   :  { %1135 = dma.done.wait [#allocation7], 256  }
  0x26   :  { %1136 = vsyncadd [#allocation7], 4294967040  ;;  %vm63_vm0 = vcmask 130048   ;;  %v54_v0 = vld [vmem:[#allocation6] sm:$0xff]  ;;  %v55_v1 = vld [vmem:[#allocation6 + $0x8] sm:$0xff]  ;;  %v1143_v8 = vmov 0.0|0.0   ;;  %v151_v15 = vlaneseq }
  0x27   :  { %v52_v2 = vld [vmem:[#allocation3] sm:$0xff]  ;;  %v990_v3 = vpack.c.bf16 %v55_v1, %v54_v0  ;;  %v53_v4 = vld [vmem:[#allocation3 + $0x8] sm:$0xff]  ;;  %v198_v5 = vld [vmem:[%s1317_s2] sm:$0xff]  ;;  %994 = vmatprep.subr.bf16.mxu1 %v1143_v8  ;;  %vm1144_vm1 = vmmov 0   ;;  %v1145_v11 = vmov 0.0   ;;  %vm189_vm2 = vcmask 254976  }
  0x28   :  { %899 = vmatprep.mubr.msk.f32.mxu0 %vm63_vm0, %v52_v2  ;;  %v199_v6 = vld [vmem:[%s1317_s2 + $0x8] sm:$0xff]  ;;  %v200_v7 = vld [vmem:[%s1317_s2 + $0x10] sm:$0xff]  ;;  %v201_v10 = vld [vmem:[%s1317_s2 + $0x18] sm:$0xff]  ;;  %910 = vmatprep.mubr.msk.f32.mxu1 %vm1144_vm1, %v1145_v11  ;;  %v1146_v13 = vmov 1983009808   ;;  %v152_v17 = vshrl.u32 %v151_v15, 7 }
  0x29   :  { %991 = vmatprep.subr.bf16.mxu0 %v990_v3  ;;  %v1217_v9 = vpack.c.bf16 %v199_v6, %v198_v5  ;;  %v1228_v12 = vpack.c.bf16 %v201_v10, %v200_v7  ;;  %v149_v14 = vunpack.c.l.s4 %v1146_v13  ;;  %v839_v18 = vld [vmem:[%s1318_s3] ss:$0 sm:$0xff]  ;;  %vm206_vm3 = vcmask 261120   ;;  %v740_v6 = vld [vmem:[%s1319_s4 + $0x18] sm:$0xff]  ;;  %s1147_s15 = smov [#allocation8]  }
  0x2a   :  { %993 = vmatpush3.bf16.msra.mxu0 %v990_v3  ;;  %v737_v2 = vld [vmem:[%s1319_s4] sm:$0xff]  ;;  %v738_v3 = vld [vmem:[%s1319_s4 + $0x8] sm:$0xff]  ;;  %s829_s16 = sshll.u32 %s1147_s15, 4  ;;  %vm821_vm4 = vcmask 58368   ;;  %s830_s16 = int_to_ptr.vmem [resolvable:$true] %s829_s16 }
  0x2b   :  { %1000 = vmatprep.subr.bf16.mxu0 %v1143_v8  ;;  %996 = vmatpush3.bf16.msra.mxu1 %v1217_v9  ;;  %v150_v16 = vunpack.c.0.s8 %v149_v14  ;;  %v1037_v5 = vpack.c.bf16 %v738_v3, %v737_v2  ;;  %v849_v14 = vld [vmem:[%s1320_s5] ss:$0 sm:$0xff]  ;;  %p1116_p3 = scmp.lt.s32.totalorder %s830_s16, %s830_s16 }
  0x2c   :  { %997 = vmatprep.subr.bf16.mxu1 %v1143_v8 }
  0x2d   :  { %900 = vmatmul.mubr.msk.f32.vlgmr.msra.gmra.mrb[0].mxu0 %vm63_vm0, %v53_v4  ;;  %v153_v19 = vsub.s32 %v150_v16, %v152_v17  ;;  %v739_v4 = vld [vmem:[%s1319_s4 + $0x10] sm:$0xff]  ;;  %s1111_s4 = scalar_lea.vmem %s830_s16, 32 }
  0x2e   :  { %921 = vmatprep.mubr.msk.f32.mxu0 %vm1144_vm1, %v1145_v11  ;;  %1002 = vmatpush3.bf16.msra.mxu0 %v1217_v9  ;;  %v1040_v7 = vpack.c.bf16 %v740_v6, %v739_v4  ;;  %p1112_p2 = scmp.ne.s32.totalorder %s830_s16, %s1111_s4  ;;  %p1117_p4 = scmp.lt.s32.totalorder %s1111_s4, %s1111_s4 }
  0x2f   :  { %1003 = vmatprep.subr.bf16.mxu0 %v1143_v8  ;;  %999 = vmatpush3.bf16.msra.mxu1 %v1228_v12 }
  0x30   :  { %1006 = vmatprep.subr.bf16.mxu1 %v1143_v8  ;;  %p1118_p5 = por %p1117_p4, %p1116_p3 }
  0x32   :  { %1005 = vmatpush3.bf16.msra.mxu0 %v1228_v12  ;;  %p1119_p6 = pnand %p1118_p5, %p1112_p2 }
  0x33   :  { %1012 = vmatprep.subr.bf16.mxu0 %v1143_v8 }
 0x100   :  { %v901_v20 = vpop.f32.mrb[0].mxu0 }
 0x101   :  { %v142_v21 = vadd.f32 %v901_v20, %v839_v18  ;;  %v136_v22 = vpop.f32.mrb[1].mxu0 }
 0x102   :  { %v137_v23 = vadd.f32 %v839_v18, %v136_v22 }
 0x103   :  { %v164_v24 = vcombine.high %v142_v21, %v142_v21  ;;  %v171_v25 = vrot.slane %v142_v21, %v153_v19 }
 0x104   :  { %v147_v26 = vcombine.high %v137_v23, %v137_v23  ;;  %v154_v27 = vrot.slane %v137_v23, %v153_v19 }
 0x105   :  { %v178_v28 = vrot.slane %v164_v24, %v153_v19  ;;  %v179_v29 = vcombine.high %v171_v25, %v171_v25  ;;  %194 = vst.msk [vmem:[#allocation2 + $0x8] sm:$0x3] %vm189_vm2, %v171_v25 }
 0x106   :  { %v161_v30 = vrot.slane %v147_v26, %v153_v19  ;;  %v162_v31 = vcombine.high %v154_v27, %v154_v27  ;;  %190 = vst.msk [vmem:[#allocation2] sm:$0x3] %vm189_vm2, %v154_v27 }
 0x107   :  { %v180_v32 = vcombine.high %v178_v28, %v178_v28  ;;  %195 = vst.msk [vmem:[#allocation2 + $0xa] sm:$0x3] %vm189_vm2, %v179_v29  ;;  %196 = vst.msk [vmem:[#allocation2 + $0xc] sm:$0x3] %vm189_vm2, %v178_v28 }
 0x108   :  { %v163_v33 = vcombine.high %v161_v30, %v161_v30  ;;  %191 = vst.msk [vmem:[#allocation2 + $0x2] sm:$0x3] %vm189_vm2, %v162_v31  ;;  %192 = vst.msk [vmem:[#allocation2 + $0x4] sm:$0x3] %vm189_vm2, %v161_v30 }
 0x109   :  { %197 = vst.msk [vmem:[#allocation2 + $0xe] sm:$0x3] %vm189_vm2, %v180_v32 }
 0x10a   :  { %193 = vst.msk [vmem:[#allocation2 + $0x6] sm:$0x3] %vm189_vm2, %v163_v33 }
 0x10c   :  { %v434_v51 = vld [vmem:[#allocation2 + $0x8] sm:$0x3] }
 0x10d   :  { %v202_v34 = vld [vmem:[#allocation2] sm:$0x3] }
 0x10e   :  { %1051 = vtanh.f32 %v202_v34  ;;  %v510_v56 = vld [vmem:[#allocation2 + $0xa] sm:$0x3]  ;;  %v586_v61 = vld [vmem:[#allocation2 + $0xc] sm:$0x3] }
 0x10f   :  { %v205_v36 = vld [vmem:[#allocation2 + $0x2] sm:$0x3]  ;;  %v282_v41 = vld [vmem:[#allocation2 + $0x4] sm:$0x3] }
 0x111   :  { %v358_v46 = vld [vmem:[#allocation2 + $0x6] sm:$0x3] }
 0x118   :  { %v1052_v35 = vpop.eup %1051 }
 0x119   :  { %911 = vmatmul.mubr.msk.f32.vlgmr.msra.gmra.mrb[0].mxu1 %vm206_vm3, %v1052_v35 }
 0x11a   :  { %1008 = vmatpush3.bf16.msra.mxu1 %v1217_v9  ;;  %932 = vmatprep.mubr.msk.f32.mxu1 %vm1144_vm1, %v1145_v11 }
 0x11b   :  { %1009 = vmatprep.subr.bf16.mxu1 %v1143_v8 }
 0x11e   :  { %1011 = vmatpush3.bf16.msra.mxu1 %v1228_v12 }
 0x11f   :  { %1018 = vmatprep.subr.bf16.mxu1 %v1143_v8 }
 0x1ec   :  { %v276_v37 = vpop.f32.mrb[0].mxu1 }
 0x1ed   :  { %v277_v38 = vadd.f32 %v276_v37, %v205_v36  ;;  %v912_v39 = vpop.f32.mrb[1].mxu1 }
 0x1ef   :  { %1053 = vtanh.f32 %v277_v38 }
 0x1f9   :  { %v1054_v40 = vpop.eup %1053 }
 0x1fa   :  { %922 = vmatmul.mubr.msk.f32.vlgmr.msra.gmra.mrb[2].mxu0 %vm206_vm3, %v1054_v40 }
 0x1fb   :  { %1014 = vmatpush3.bf16.msra.mxu0 %v1217_v9  ;;  %943 = vmatprep.mubr.msk.f32.mxu0 %vm1144_vm1, %v1145_v11 }
 0x1fc   :  { %1015 = vmatprep.subr.bf16.mxu0 %v1143_v8 }
 0x1ff   :  { %1017 = vmatpush3.bf16.msra.mxu0 %v1228_v12 }
 0x200   :  { %1024 = vmatprep.subr.bf16.mxu0 %v1143_v8 }
 0x2cd   :  { %v352_v42 = vpop.f32.mrb[2].mxu0 }
 0x2ce   :  { %v353_v43 = vadd.f32 %v352_v42, %v282_v41  ;;  %v923_v44 = vpop.f32.mrb[3].mxu0 }
 0x2d0   :  { %1055 = vtanh.f32 %v353_v43 }
 0x2da   :  { %v1056_v45 = vpop.eup %1055 }
 0x2db   :  { %933 = vmatmul.mubr.msk.f32.vlgmr.msra.gmra.mrb[2].mxu1 %vm206_vm3, %v1056_v45 }
 0x2dc   :  { %1020 = vmatpush3.bf16.msra.mxu1 %v1217_v9  ;;  %954 = vmatprep.mubr.msk.f32.mxu1 %vm1144_vm1, %v1145_v11 }
 0x2dd   :  { %1021 = vmatprep.subr.bf16.mxu1 %v1143_v8 }
 0x2e0   :  { %1023 = vmatpush3.bf16.msra.mxu1 %v1228_v12 }
 0x2e1   :  { %1030 = vmatprep.subr.bf16.mxu1 %v1143_v8 }
 0x3ae   :  { %v428_v47 = vpop.f32.mrb[2].mxu1 }
 0x3af   :  { %v429_v48 = vadd.f32 %v428_v47, %v358_v46  ;;  %v934_v49 = vpop.f32.mrb[3].mxu1 }
 0x3b1   :  { %1057 = vtanh.f32 %v429_v48 }
 0x3bb   :  { %v1058_v50 = vpop.eup %1057 }
 0x3bc   :  { %944 = vmatmul.mubr.msk.f32.vlgmr.msra.gmra.mrb[4].mxu0 %vm206_vm3, %v1058_v50 }
 0x3bd   :  { %1026 = vmatpush3.bf16.msra.mxu0 %v1217_v9  ;;  %965 = vmatprep.mubr.msk.f32.mxu0 %vm1144_vm1, %v1145_v11 }
 0x3be   :  { %1027 = vmatprep.subr.bf16.mxu0 %v1143_v8 }
 0x3c1   :  { %1029 = vmatpush3.bf16.msra.mxu0 %v1228_v12 }
 0x3c2   :  { %1036 = vmatprep.subr.bf16.mxu0 %v1143_v8 }
 0x48f   :  { %v504_v52 = vpop.f32.mrb[4].mxu0 }
 0x490   :  { %v505_v53 = vadd.f32 %v504_v52, %v434_v51  ;;  %v945_v54 = vpop.f32.mrb[5].mxu0 }
 0x492   :  { %1059 = vtanh.f32 %v505_v53 }
 0x49c   :  { %v1060_v55 = vpop.eup %1059 }
 0x49d   :  { %955 = vmatmul.mubr.msk.f32.vlgmr.msra.gmra.mrb[4].mxu1 %vm206_vm3, %v1060_v55 }
 0x49e   :  { %1032 = vmatpush3.bf16.msra.mxu1 %v1217_v9  ;;  %976 = vmatprep.mubr.msk.f32.mxu1 %vm1144_vm1, %v1145_v11  ;;  %v662_v9 = vld [vmem:[#allocation2 + $0xe] sm:$0x3] }
 0x49f   :  { %1033 = vmatprep.subr.bf16.mxu1 %v1143_v8 }
 0x4a2   :  { %1035 = vmatpush3.bf16.msra.mxu1 %v1228_v12 }
 0x570   :  { %v580_v57 = vpop.f32.mrb[4].mxu1 }
 0x571   :  { %v581_v58 = vadd.f32 %v580_v57, %v510_v56  ;;  %v956_v59 = vpop.f32.mrb[5].mxu1 }
 0x573   :  { %1061 = vtanh.f32 %v581_v58 }
 0x57d   :  { %v1062_v60 = vpop.eup %1061 }
 0x57e   :  { %966 = vmatmul.mubr.msk.f32.vlgmr.msra.gmra.mrb[6].mxu0 %vm206_vm3, %v1062_v60 }
 0x57f   :  { %987 = vmatprep.mubr.msk.f32.mxu0 %vm1144_vm1, %v1145_v11  ;;  %1038 = vmatpush3.bf16.msra.mxu0 %v1037_v5 }
 0x580   :  { %1039 = vmatprep.subr.bf16.mxu0 %v1143_v8 }
 0x583   :  { %1041 = vmatpush3.bf16.msra.mxu0 %v1040_v7 }
 0x651   :  { %v656_v62 = vpop.f32.mrb[6].mxu0 }
 0x652   :  { %v657_v63 = vadd.f32 %v656_v62, %v586_v61  ;;  %v967_v0 = vpop.f32.mrb[7].mxu0 }
 0x654   :  { %1063 = vtanh.f32 %v657_v63 }
 0x65e   :  { %v1064_v1 = vpop.eup %1063 }
 0x65f   :  { %977 = vmatmul.mubr.msk.f32.vlgmr.msra.gmra.mrb[6].mxu1 %vm206_vm3, %v1064_v1 }
 0x732   :  { %v732_v10 = vpop.f32.mrb[6].mxu1 }
 0x733   :  { %v733_v11 = vadd.f32 %v732_v10, %v662_v9  ;;  %v978_v12 = vpop.f32.mrb[7].mxu1 }
 0x735   :  { %1065 = vtanh.f32 %v733_v11 }
 0x73f   :  { %v1066_v13 = vpop.eup %1065 }
 0x740   :  { %988 = vmatmul.mubr.msk.f32.vlgmr.msra.gmra.mrb[8].mxu0 %vm206_vm3, %v1066_v13 }
 0x813   :  { %v817_v15 = vpop.f32.mrb[8].mxu0 }
 0x814   :  { %v818_v16 = vadd.f32 %v849_v14, %v817_v15  ;;  %v989_v17 = vpop.f32.mrb[9].mxu0 }
 0x816   :  { %822 = vst.msk [vmem:[#allocation8] sm:$0x3] %vm821_vm4, %v818_v16 }
 0x817   :  { %1122 = shalt.err (!%p1119_p6)
}
 0x818   :  { %s1123_s19 = scalar_lea.hbm %s1321_s6, 32 }
 0x819   :  { %p1124_p7 = scmp.ne.s32.totalorder %s1321_s6, %s1123_s19  ;;  %p1127_p8 = scmp.lt.u32.totalorder %s1123_s19, %s1321_s6 }
 0x81b   :  { %p1129_p9 = pnand %p1127_p8, %p1124_p7 }
 0x81d   :  { %1132 = shalt.err (!%p1129_p9)
}
 0x81e   :  { %832 = dma.vmem_to_hbm [thread:$0]  %s830_s16, 32, %s1321_s6, [#allocation5]  }
 0x81f   :  { %1137 = dma.done.wait [#allocation5], 32  }
 0x820   :  { %1138 = vsyncadd [#allocation5], 4294967264 }
 0x821   :  { %836 = vsyncpa [#allocation4], 1 }
 0x822   :  { %837 = vsyncpa [#allocation7], 1 }
 0x823   :  { %838 = vsyncpa [#allocation5], 1 }

</bundles_post_ra>
